<compile_context>
chip_gen: v5e
topology: v5e:2x2
jax: 0.10.0
libtpu: 0.0.40
codegen_flags: <defaults>
</compile_context>

<pallas_src>
import functools

import jax
import jax.numpy as jnp
import numpy as np
from jax.experimental import pallas as pl
from jax.experimental.pallas import tpu as pltpu

LANE = 128


def _round_up(v, m):
    return ((v + m - 1) // m) * m


def _nlunet_kernel(x_ref, wc_ref, wl_ref, b_ref, out_ref, *, n_groups, kspan, d):
    # x_ref  : (TB, SD_PAD)            bf16  flattened, zero-padded input rows
    # wc_ref : (n_groups, KSPAN, 256)  bf16  dense per-window-pair conv weights
    # wl_ref : (128, 128)              bf16  padded linear weight (rows >= C zero)
    # b_ref  : (1, 128)                f32   combined bias = conv_b @ lin_w.T + lin_b
    # out_ref: (TB, 128)               f32   padded class scores (lane-dense store)
    xv = x_ref[...]                                            # (TB, SD_PAD) bf16
    pooled = None
    for g in range(n_groups):                                  # small static count -> unrolled
        base = 2 * g * d                                       # static lane offset
        xs = xv[:, base:base + kspan]                          # (TB, KSPAN) bf16
        acc = jnp.dot(xs, wc_ref[g],
                      preferred_element_type=jnp.float32)      # (TB, 256) f32
        gmax = jnp.maximum(acc[:, :LANE], acc[:, LANE:])       # fold the 2 windows (VPU)
        pooled = gmax if pooled is None else jnp.maximum(pooled, gmax)
    out_ref[...] = (
        jnp.dot(pooled.astype(jnp.bfloat16), wl_ref[...],
                preferred_element_type=jnp.float32)
        + b_ref[...]
    )


def make_nlunet_params(conv_w, conv_b, lin_w, lin_b, window_size, seq_len):
    """One-time host-side (numpy) weight prep; weights are static per model."""
    conv_w = np.asarray(conv_w, np.float32)
    conv_b = np.asarray(conv_b, np.float32)
    lin_w = np.asarray(lin_w, np.float32)
    lin_b = np.asarray(lin_b, np.float32)

    C, _, W, D = conv_w.shape
    assert W == window_size
    K = lin_w.shape[0]
    S = seq_len
    T = S - W + 1
    WD = W * D

    n_groups = (T + 1) // 2                           # two windows per 256-lane group
    kspan = _round_up((W + 1) * D, 8)                 # uniform per-group contraction span
    sd_pad = _round_up(max(S * D, 2 * (n_groups - 1) * D + kspan), LANE)

    # Dense per-group conv weight. Group g holds windows (2g, min(2g+1, T-1)):
    #   columns [0,C)        <- window 2g   at group-local rows [0, WD)
    #   columns [128,128+C)  <- window 2g+1 at group-local rows [(w1-w0)*D, ...+WD)
    w_flat_t = conv_w.reshape(C, WD).T                # (WD, C), rows ordered (w, d)
    wc = np.zeros((n_groups, kspan, 2 * LANE), np.float32)
    for g in range(n_groups):
        w0 = 2 * g
        w1 = min(2 * g + 1, T - 1)                    # duplicate last window if T is odd
        wc[g, 0:WD, 0:C] = w_flat_t
        off = (w1 - w0) * D
        wc[g, off:off + WD, LANE:LANE + C] = w_flat_t

    # Padded linear weight and combined bias (conv bias folded through the
    # Linear layer; valid because NLUNet has no activation before the max).
    wl = np.zeros((LANE, LANE), np.float32)
    wl[:C, :K] = lin_w.T
    bias = np.zeros((1, LANE), np.float32)
    bias[0, :K] = conv_b @ lin_w.T + lin_b

    return dict(
        wc=jnp.asarray(wc, jnp.bfloat16),
        wl=jnp.asarray(wl, jnp.bfloat16),
        bias=jnp.asarray(bias, jnp.float32),
        geom=dict(S=S, D=D, W=W, C=C, K=K, T=T,
                  n_groups=n_groups, kspan=kspan, sd_pad=sd_pad),
    )


def nlunet_forward(x, params):
    g = params["geom"]
    B, S, D = x.shape
    assert S == g["S"] and D == g["D"]
    SD = S * D
    sd_pad = g["sd_pad"]
    n_groups = g["n_groups"]
    kspan = g["kspan"]
    K = g["K"]

    # Batch tile: multiple of 16 (bf16 sublane packing), capped at 128 (vregs).
    TB = min(max(_round_up(B, 16), 16), 128)
    B_pad = _round_up(B, TB)
    grid_b = B_pad // TB

    x_flat = x.reshape(B, SD).astype(jnp.bfloat16)
    x_flat = jnp.pad(x_flat, ((0, B_pad - B), (0, sd_pad - SD)))

    kernel = functools.partial(_nlunet_kernel,
                               n_groups=n_groups, kspan=kspan, d=D)

    cost = pl.CostEstimate(
        flops=2 * B_pad * kspan * 2 * LANE * n_groups + 2 * B_pad * LANE * LANE,
        transcendentals=0,
        bytes_accessed=(B_pad * sd_pad * 2
                        + n_groups * kspan * 2 * LANE * 2
                        + LANE * LANE * 2
                        + LANE * 4
                        + B_pad * LANE * 4),
    )

    out_pad = pl.pallas_call(
        kernel,
        out_shape=jax.ShapeDtypeStruct((B_pad, LANE), jnp.float32),
        grid=(grid_b,),
        in_specs=[
            pl.BlockSpec((TB, sd_pad), lambda i: (i, 0)),
            pl.BlockSpec((n_groups, kspan, 2 * LANE), lambda i: (0, 0, 0)),
            pl.BlockSpec((LANE, LANE), lambda i: (0, 0)),
            pl.BlockSpec((1, LANE), lambda i: (0, 0)),
        ],
        out_specs=pl.BlockSpec((TB, LANE), lambda i: (i, 0)),
        compiler_params=pltpu.CompilerParams(
            dimension_semantics=("parallel",)),
        cost_estimate=cost,
    )(x_flat, params["wc"], params["wl"], params["bias"])

    return out_pad[:B, :K]


def nlunet_reference(x, conv_w, conv_b, lin_w, lin_b, window_size):
    """Pure-JAX f32 reference mirroring the PyTorch forward exactly."""
    B, S, D = x.shape
    C = conv_w.shape[0]
    T = S - window_size + 1
    wc_flat = conv_w.reshape(C, window_size * D)
    conv_out = jnp.stack(
        [
            x[:, t:t + window_size, :].reshape(B, -1) @ wc_flat.T + conv_b
            for t in range(T)
        ],
        axis=2,
    )  # (B, C, T)
    pooled = conv_out.max(axis=2)                              # (B, C)
    return pooled @ lin_w.T + lin_b                            # (B, K)


if __name__ == "__main__":
    # Shapes from the module's usage: NLUNet(word_dim=10, window_size=3,
    # out_channels=15, K=3) applied to x of shape (30, 5, 10).
    B, S, D = 30, 5, 10
    WINDOW = 3
    C = 15
    K = 3

    key = jax.random.PRNGKey(0)
    kx, kcw, kcb, klw, klb = jax.random.split(key, 5)

    x = jax.random.normal(kx, (B, S, D), dtype=jnp.float32)

    # Deterministic parameter init (uniform, fan-in scaled, like PyTorch defaults).
    conv_fan_in = 1 * WINDOW * D
    conv_bound = 1.0 / float(np.sqrt(conv_fan_in))
    conv_w = jax.random.uniform(
        kcw, (C, 1, WINDOW, D), jnp.float32, -conv_bound, conv_bound)
    conv_b = jax.random.uniform(kcb, (C,), jnp.float32, -conv_bound, conv_bound)

    lin_bound = 1.0 / float(np.sqrt(C))
    lin_w = jax.random.uniform(klw, (K, C), jnp.float32, -lin_bound, lin_bound)
    lin_b = jax.random.uniform(klb, (K,), jnp.float32, -lin_bound, lin_bound)

    # One-time static weight prep (hoisted out of the per-call path).
    params = make_nlunet_params(conv_w, conv_b, lin_w, lin_b, WINDOW, S)

    out = nlunet_forward(x, params)
    out = jax.block_until_ready(out)

    ref = nlunet_reference(x, conv_w, conv_b, lin_w, lin_b, WINDOW)
    assert out.shape == (B, K), out.shape
    # Tolerance reflects bf16 MXU inputs / bf16 pooled activations (f32 accumulation).
    err = jnp.max(jnp.abs(out - ref))
    assert jnp.allclose(out, ref, atol=5e-2, rtol=5e-2), f"max abs err {err}"
    print("KERNEL_OK")
</pallas_src>

<mosaic_0001>
module attributes {stable_mosaic.version = 11 : i64} {
  func.func @_nlunet_kernel(%arg0: i32, %arg1: memref<32x128xbf16, #tpu.memory_space<vmem>>, %arg2: memref<2x40x256xbf16, #tpu.memory_space<vmem>>, %arg3: memref<128x128xbf16, #tpu.memory_space<vmem>>, %arg4: memref<1x128xf32, #tpu.memory_space<vmem>>, %arg5: memref<32x128xf32, #tpu.memory_space<vmem>>) attributes {dimension_semantics = [#tpu.dimension_semantics<parallel>], iteration_bounds = array<i64: 1>, scalar_prefetch = 0 : i64, scratch_operands = 0 : i64, tpu.core_type = #tpu.core_type<tc>, window_params = [{transform_indices = @transform_0, window_bounds = array<i64: 32, 128>}, {pipeline_mode = #tpu.pipeline_mode<synchronous>, transform_indices = @transform_1, window_bounds = array<i64: 2, 40, 256>}, {pipeline_mode = #tpu.pipeline_mode<synchronous>, transform_indices = @transform_2, window_bounds = array<i64: 128, 128>}, {pipeline_mode = #tpu.pipeline_mode<synchronous>, transform_indices = @transform_3, window_bounds = array<i64: 1, 128>}, {transform_indices = @transform_4, window_bounds = array<i64: 32, 128>}]} {
    %c0 = arith.constant 0 : index
    %c0_0 = arith.constant 0 : index
    %0 = vector.load %arg1[%c0, %c0_0] : memref<32x128xbf16, #tpu.memory_space<vmem>>, vector<32x128xbf16>
    %1 = vector.extract_strided_slice %0 {offsets = [0, 0], sizes = [32, 40], strides = [1, 1]} : vector<32x128xbf16> to vector<32x40xbf16>
    %c0_1 = arith.constant 0 : index
    %c0_2 = arith.constant 0 : index
    %c0_3 = arith.constant 0 : index
    %2 = vector.load %arg2[%c0_1, %c0_2, %c0_3] : memref<2x40x256xbf16, #tpu.memory_space<vmem>>, vector<1x40x256xbf16>
    %3 = vector.shape_cast %2 : vector<1x40x256xbf16> to vector<40x256xbf16>
    %cst = arith.constant dense<0.000000e+00> : vector<32x256xf32>
    %4 = tpu.matmul %1, %3, %cst {dimension_numbers = #tpu.dot_dimension_numbers<[1], [0], [0], [1], [0, 0, 1, 1], [], []>} : vector<32x40xbf16>, vector<40x256xbf16>, vector<32x256xf32> -> vector<32x256xf32>
    %5 = vector.extract_strided_slice %4 {offsets = [0, 0], sizes = [32, 128], strides = [1, 1]} : vector<32x256xf32> to vector<32x128xf32>
    %6 = vector.extract_strided_slice %4 {offsets = [0, 128], sizes = [32, 128], strides = [1, 1]} : vector<32x256xf32> to vector<32x128xf32>
    %7 = arith.maximumf %5, %6 : vector<32x128xf32>
    %8 = vector.extract_strided_slice %0 {offsets = [0, 20], sizes = [32, 40], strides = [1, 1]} : vector<32x128xbf16> to vector<32x40xbf16>
    %c1 = arith.constant 1 : index
    %c0_4 = arith.constant 0 : index
    %c0_5 = arith.constant 0 : index
    %9 = vector.load %arg2[%c1, %c0_4, %c0_5] : memref<2x40x256xbf16, #tpu.memory_space<vmem>>, vector<1x40x256xbf16>
    %10 = vector.shape_cast %9 : vector<1x40x256xbf16> to vector<40x256xbf16>
    %cst_6 = arith.constant dense<0.000000e+00> : vector<32x256xf32>
    %11 = tpu.matmul %8, %10, %cst_6 {dimension_numbers = #tpu.dot_dimension_numbers<[1], [0], [0], [1], [0, 0, 1, 1], [], []>} : vector<32x40xbf16>, vector<40x256xbf16>, vector<32x256xf32> -> vector<32x256xf32>
    %12 = vector.extract_strided_slice %11 {offsets = [0, 0], sizes = [32, 128], strides = [1, 1]} : vector<32x256xf32> to vector<32x128xf32>
    %13 = vector.extract_strided_slice %11 {offsets = [0, 128], sizes = [32, 128], strides = [1, 1]} : vector<32x256xf32> to vector<32x128xf32>
    %14 = arith.maximumf %12, %13 : vector<32x128xf32>
    %15 = arith.maximumf %7, %14 : vector<32x128xf32>
    %16 = arith.truncf %15 : vector<32x128xf32> to vector<32x128xbf16>
    %c0_7 = arith.constant 0 : index
    %c0_8 = arith.constant 0 : index
    %17 = vector.load %arg3[%c0_7, %c0_8] : memref<128x128xbf16, #tpu.memory_space<vmem>>, vector<128x128xbf16>
    %cst_9 = arith.constant dense<0.000000e+00> : vector<32x128xf32>
    %18 = tpu.matmul %16, %17, %cst_9 {dimension_numbers = #tpu.dot_dimension_numbers<[1], [0], [0], [1], [0, 0, 1, 1], [], []>} : vector<32x128xbf16>, vector<128x128xbf16>, vector<32x128xf32> -> vector<32x128xf32>
    %c0_10 = arith.constant 0 : index
    %c0_11 = arith.constant 0 : index
    %19 = vector.load %arg4[%c0_10, %c0_11] : memref<1x128xf32, #tpu.memory_space<vmem>>, vector<1x128xf32>
    %20 = vector.broadcast %19 : vector<1x128xf32> to vector<32x128xf32>
    %21 = arith.addf %18, %20 : vector<32x128xf32>
    %c0_12 = arith.constant 0 : index
    %c0_13 = arith.constant 0 : index
    %22 = vector.load %arg5[%c0_12, %c0_13] : memref<32x128xf32, #tpu.memory_space<vmem>>, vector<32x128xf32>
    tpu.vector_store %arg5[%c0_12, %c0_13], %21 {strides = array<i32>} : memref<32x128xf32, #tpu.memory_space<vmem>>, vector<32x128xf32>,
    return
  }
  func.func @transform_0(%arg0: i32) -> (i32, i32) {
    %c0_i32 = arith.constant 0 : i32
    %c0_i32_0 = arith.constant 0 : i32
    return %arg0, %c0_i32 : i32, i32
  }
  func.func @transform_1(%arg0: i32) -> (i32, i32, i32) {
    %c0_i32 = arith.constant 0 : i32
    %c0_i32_0 = arith.constant 0 : i32
    %c0_i32_1 = arith.constant 0 : i32
    %c0_i32_2 = arith.constant 0 : i32
    return %c0_i32, %c0_i32_0, %c0_i32_1 : i32, i32, i32
  }
  func.func @transform_2(%arg0: i32) -> (i32, i32) {
    %c0_i32 = arith.constant 0 : i32
    %c0_i32_0 = arith.constant 0 : i32
    %c0_i32_1 = arith.constant 0 : i32
    return %c0_i32, %c0_i32_0 : i32, i32
  }
  func.func @transform_3(%arg0: i32) -> (i32, i32) {
    %c0_i32 = arith.constant 0 : i32
    %c0_i32_0 = arith.constant 0 : i32
    %c0_i32_1 = arith.constant 0 : i32
    return %c0_i32, %c0_i32_0 : i32, i32
  }
  func.func @transform_4(%arg0: i32) -> (i32, i32) {
    %c0_i32 = arith.constant 0 : i32
    %c0_i32_0 = arith.constant 0 : i32
    return %arg0, %c0_i32 : i32, i32
  }
}

</mosaic_0001>

<bundles_post_ra>
// kernel: tpu_custom_call.1
= control target key start
LH: loop header
LB: loop body
LE: loop exit
PB: predicated region body
PF: predicated region fallthrough
CT: control target
= control target key end

     0   :  { %9 = vsyncpa [#allocation3], 0  ;;  %s659_s0 = inlined_call_operand.hbm [shape: bf16[32,128], index: 0, kind: input, shape index: {}]   ;;  %s660_s1 = inlined_call_operand.hbm [shape: bf16[2,40,256], index: 1, kind: input, shape index: {}]   ;;  %s661_s2 = inlined_call_operand.hbm [shape: bf16[128,128], index: 2, kind: input, shape index: {}]   ;;  %s662_s3 = inlined_call_operand.vmem [shape: f32[1,128], index: 3, kind: input, shape index: {}]   ;;  %s663_s4 = inlined_call_operand.hbm [shape: f32[32,128], index: 4, kind: output, shape index: {}]  }
   0x1   :  { %10 = vsyncpa [#allocation6], 0  ;;  %s29_s17 = sshll.u32 %s660_s1, 4  ;;  %s30_s17 = int_to_ptr.hbm [resolvable:$true] %s29_s17 }
   0x2   :  { %11 = vsyncpa [#allocation4], 0  ;;  %s590_s18 = smov [#allocation5]   ;;  %s16_s22 = sshll.u32 %s659_s0, 4  ;;  %s17_s22 = int_to_ptr.hbm [resolvable:$true] %s16_s22 }
   0x3   :  { %s31_s19 = sshll.u32 %s590_s18, 4  ;;  %s591_s23 = smov 128   ;;  %s32_s19 = int_to_ptr.vmem [resolvable:$true] %s31_s19 }
   0x4   :  { %s592_s24 = smov 8   ;;  %s593_s25 = smov [#allocation2]  }
   0x5   :  { %37 = dma.hbm_to_vmem [thread:$0]  %s30_s17, 1280, %s32_s19, [#allocation6], %s591_s23, %s591_s23, %s592_s24  }
   0x6   :  { %s18_s26 = sshll.u32 %s593_s25, 4  ;;  %s594_s1 = smov 64   ;;  %s19_s26 = int_to_ptr.vmem [resolvable:$true] %s18_s26 }
   0x7   :  { %s595_s27 = smov 4   ;;  %s42_s30 = sshll.u32 %s661_s2, 4  ;;  %s43_s30 = int_to_ptr.hbm [resolvable:$true] %s42_s30 }
   0x8   :  { %24 = dma.hbm_to_vmem [thread:$0]  %s17_s22, 256, %s19_s26, [#allocation3], %s594_s1, %s594_s1, %s595_s27  }
   0x9   :  { %s596_s5 = smov [#allocation7]  }
   0xa   :  { %s44_s0 = sshll.u32 %s596_s5, 4  ;;  %s45_s0 = int_to_ptr.vmem [resolvable:$true] %s44_s0 }
   0xb   :  { %50 = dma.hbm_to_vmem [thread:$0]  %s43_s30, 1024, %s45_s0, [#allocation6], %s594_s1, %s594_s1, %s595_s27  }
   0xc   :  { %584 = dma.done.wait [#allocation3], 256  }
   0xd   :  { %585 = vsyncadd [#allocation3], 4294967040 }
   0xe   :  { %586 = dma.done.wait [#allocation6], 2304  }
   0xf   :  { %587 = vsyncadd [#allocation6], 4294964992  ;;  %v452_v0 = vld [vmem:[#allocation2] sm:$0xff]  ;;  %v74_v1 = vld [vmem:[#allocation5 + $0x20] sm:$0xff]  ;;  %s597_s6 = smov 108   ;;  %vm117_vm0 = vcmask 1043456  }
  0x10   :  { %v98_v2 = vunpack.c.l.b16 %v74_v1  ;;  %v99_v3 = vunpack.c.h.b16 %v74_v1  ;;  %v171_v4 = vld [vmem:[#allocation5 + $0x48] sm:$0xff]  ;;  %172 = vrot.lane.b32.xlu0 %v452_v0, %s597_s6  ;;  %v390_v9 = vld [vmem:[#allocation5 + $0x10] sm:$0xf]  ;;  %v457_v10 = vld [vmem:[#allocation5 + $0x14] sm:$0xf0]  ;;  %vm110_vm1 = vcmask 326656  }
  0x11   :  { %v189_v5 = vunpack.c.l.b16 %v171_v4  ;;  %v190_v6 = vunpack.c.h.b16 %v171_v4  ;;  %v456_v11 = vld [vmem:[#allocation5 + $0x14] sm:$0xf]  ;;  %v392_v14 = vld [vmem:[#allocation5 + $0x18] sm:$0xf0]  ;;  %v410_v15 = vld [vmem:[#allocation5 + $0x38] sm:$0xf]  ;;  %v391_v24 = vor.u32 %v457_v10, %v390_v9 }
  0x12   :  { %v104_v7 = vpack.c.b16 %v98_v2, %v98_v2  ;;  %v105_v8 = vpack.c.b16 %v99_v3, %v99_v3  ;;  %v461_v16 = vld [vmem:[#allocation5 + $0x3c] sm:$0xf0]  ;;  %v460_v19 = vld [vmem:[#allocation5 + $0x3c] sm:$0xf]  ;;  %v412_v20 = vld [vmem:[#allocation5 + $0x40] sm:$0xf0]  ;;  %v395_v26 = vor.u32 %v456_v11, %v392_v14 }
  0x13   :  { %v195_v12 = vpack.c.b16 %v189_v5, %v189_v5  ;;  %v196_v13 = vpack.c.b16 %v190_v6, %v190_v6  ;;  %v453_v21 = vld [vmem:[#allocation2 + $0x8] sm:$0xff]  ;;  %v382_v25 = vld [vmem:[#allocation5] sm:$0xf]  ;;  %v411_v27 = vor.u32 %v461_v16, %v410_v15  ;;  %v455_v28 = vld [vmem:[#allocation5 + $0x4] sm:$0xf0]  ;;  %v415_v30 = vor.u32 %v460_v19, %v412_v20  ;;  %s598_s8 = smov [#allocation8]  }
  0x14   :  { %v119_v17 = vsel %vm117_vm0, %v104_v7, 0  ;;  %v122_v18 = vsel %vm117_vm0, %v105_v8, 0  ;;  %v454_v29 = vld [vmem:[#allocation5 + $0x4] sm:$0xf]  ;;  %v384_v31 = vld [vmem:[#allocation5 + $0x8] sm:$0xf0]  ;;  %v383_v36 = vor.u32 %v455_v28, %v382_v25 }
  0x15   :  { %129 = vmatpush.bf16.msra.mxu0 %v119_v17  ;;  %148 = vmatpush.bf16.msra.mxu1 %v122_v18  ;;  %v208_v22 = vsel %vm117_vm0, %v195_v12, 0  ;;  %v211_v23 = vsel %vm117_vm0, %v196_v13, 0  ;;  %v402_v32 = vld [vmem:[#allocation5 + $0x28] sm:$0xf]  ;;  %v459_v33 = vld [vmem:[#allocation5 + $0x2c] sm:$0xf0]  ;;  %v387_v37 = vor.u32 %v454_v29, %v384_v31 }
  0x16   :  { %218 = vmatpush.bf16.msra.mxu2 %v208_v22  ;;  %237 = vmatpush.bf16.msra.mxu3 %v211_v23  ;;  %v458_v34 = vld [vmem:[#allocation5 + $0x2c] sm:$0xf]  ;;  %v404_v35 = vld [vmem:[#allocation5 + $0x30] sm:$0xf0]  ;;  %v403_v38 = vor.u32 %v459_v33, %v402_v32  ;;  %v468_v41 = vld [vmem:[#allocation7 + $0x30] sm:$0xff]  ;;  %s356_s9 = sshll.u32 %s598_s8, 4  ;;  %s357_s9 = int_to_ptr.vmem [resolvable:$true] %s356_s9 }
  0x17   :  { %v407_v39 = vor.u32 %v458_v34, %v404_v35  ;;  %v469_v40 = vld [vmem:[#allocation7 + $0x38] sm:$0xff]  ;;  %v467_v42 = vld [vmem:[#allocation7 + $0x28] sm:$0xff]  ;;  %v466_v43 = vld [vmem:[#allocation7 + $0x20] sm:$0xff]  ;;  %s358_s12 = sshll.u32 %s663_s4, 4  ;;  %s359_s12 = int_to_ptr.hbm [resolvable:$true] %s358_s12 }
  0x18   :  { %174 = vrot.lane.b32.xlu0 %v453_v21, %s597_s6  ;;  %v465_v46 = vld [vmem:[#allocation7 + $0x18] sm:$0xff]  ;;  %v464_v47 = vld [vmem:[#allocation7 + $0x10] sm:$0xff]  ;;  %v463_v48 = vld [vmem:[#allocation7 + $0x8] sm:$0xff] }
  0x19   :  { %130 = vmatpush.bf16.msra.mxu0 %v391_v24  ;;  %149 = vmatpush.bf16.msra.mxu1 %v395_v26  ;;  %v462_v49 = vld [vmem:[#allocation7] sm:$0xff] }
  0x1a   :  { %219 = vmatpush.bf16.msra.mxu2 %v411_v27  ;;  %238 = vmatpush.bf16.msra.mxu3 %v415_v30  ;;  %v487_v16 = vld [vmem:[%s662_s3] ss:$0 sm:$0xff] }
  0x1d   :  { %131 = vmatpush.bf16.msra.mxu0 %v383_v36  ;;  %150 = vmatpush.bf16.msra.mxu1 %v387_v37 }
  0x1e   :  { %220 = vmatpush.bf16.msra.mxu2 %v403_v38  ;;  %239 = vmatpush.bf16.msra.mxu3 %v407_v39 }
  0x20   :  { %396 = vmatmul.msk.bf16.vlgmr.msra.gmra.mxu0 %vm110_vm1, %v452_v0  ;;  %398 = vmatmul.msk.bf16.vlgmr.msra.gmra.mxu1 %vm110_vm1, %v452_v0 }
  0x21   :  { %329 = vmatpush.bf16.msrb.mxu0 %v469_v40  ;;  %470 = vmatpush.bf16.msrb.mxu1 %v469_v40 }
  0x25   :  { %330 = vmatpush.bf16.msrb.mxu0 %v468_v41  ;;  %471 = vmatpush.bf16.msrb.mxu1 %v468_v41 }
  0x29   :  { %331 = vmatpush.bf16.msrb.mxu0 %v467_v42  ;;  %472 = vmatpush.bf16.msrb.mxu1 %v467_v42 }
  0x2d   :  { %332 = vmatpush.bf16.msrb.mxu0 %v466_v43  ;;  %473 = vmatpush.bf16.msrb.mxu1 %v466_v43 }
  0x30   :  { %397 = vmatmul.msk.bf16.gmra.mxu0 %vm110_vm1, %v453_v21  ;;  %399 = vmatmul.msk.bf16.gmra.mxu1 %vm110_vm1, %v453_v21 }
  0x31   :  { %333 = vmatpush.bf16.msrb.mxu0 %v465_v46  ;;  %474 = vmatpush.bf16.msrb.mxu1 %v465_v46 }
  0x35   :  { %334 = vmatpush.bf16.msrb.mxu0 %v464_v47  ;;  %475 = vmatpush.bf16.msrb.mxu1 %v464_v47 }
  0x39   :  { %335 = vmatpush.bf16.msrb.mxu0 %v463_v48  ;;  %476 = vmatpush.bf16.msrb.mxu1 %v463_v48 }
  0x3d   :  { %336 = vmatpush.bf16.msrb.mxu0 %v462_v49  ;;  %477 = vmatpush.bf16.msrb.mxu1 %v462_v49 }
  0x82   :  { %v173_v44 = vpop.permute.xlu0 %172 }
  0x83   :  { %416 = vmatmul.msk.bf16.vlgmr.msra.gmra.mxu2 %vm110_vm1, %v173_v44  ;;  %418 = vmatmul.msk.bf16.vlgmr.msra.gmra.mxu3 %vm110_vm1, %v173_v44 }
  0x8a   :  { %v175_v45 = vpop.permute.xlu0 %174 }
  0x93   :  { %417 = vmatmul.msk.bf16.gmra.mxu2 %vm110_vm1, %v175_v45  ;;  %419 = vmatmul.msk.bf16.gmra.mxu3 %vm110_vm1, %v175_v45 }
  0x9d   :  { %v133_v50 = vpop.f32.mrf.mxu0  ;;  %v152_v51 = vpop.f32.mrf.mxu1 }
  0x9e   :  { %v162_v56 = vmax.f32 %v133_v50, %v152_v51 }
  0xa5   :  { %v135_v54 = vpop.f32.mrf.mxu0  ;;  %v154_v55 = vpop.f32.mrf.mxu1 }
  0xa6   :  { %v163_v60 = vmax.f32 %v135_v54, %v154_v55 }
  0xad   :  { %v138_v0 = vpop.f32.mrf.mxu0  ;;  %v157_v1 = vpop.f32.mrf.mxu1 }
  0xae   :  { %v164_v7 = vmax.f32 %v138_v0, %v157_v1 }
  0xb5   :  { %v140_v5 = vpop.f32.mrf.mxu0  ;;  %v159_v6 = vpop.f32.mrf.mxu1 }
  0xb6   :  { %v165_v11 = vmax.f32 %v140_v5, %v159_v6 }
 0x106   :  { %v222_v52 = vpop.f32.mrf.mxu2  ;;  %v241_v53 = vpop.f32.mrf.mxu3 }
 0x107   :  { %v251_v57 = vmax.f32 %v222_v52, %v241_v53 }
 0x109   :  { %v255_v62 = vmax.f32 %v162_v56, %v251_v57 }
 0x10e   :  { %v224_v58 = vpop.f32.mrf.mxu2  ;;  %v243_v59 = vpop.f32.mrf.mxu3 }
 0x10f   :  { %v252_v61 = vmax.f32 %v224_v58, %v243_v59 }
 0x111   :  { %v256_v63 = vmax.f32 %v163_v60, %v252_v61 }
 0x113   :  { %v259_v2 = vpack.c.bf16 %v256_v63, %v255_v62 }
 0x115   :  { %337 = vmatmul.bf16.vlgmr.msrb.gmra.mxu0 %v259_v2 }
 0x116   :  { %v227_v3 = vpop.f32.mrf.mxu2  ;;  %v246_v4 = vpop.f32.mrf.mxu3 }
 0x117   :  { %v253_v8 = vmax.f32 %v227_v3, %v246_v4 }
 0x119   :  { %v257_v13 = vmax.f32 %v164_v7, %v253_v8 }
 0x11e   :  { %v229_v9 = vpop.f32.mrf.mxu2  ;;  %v248_v10 = vpop.f32.mrf.mxu3 }
 0x11f   :  { %v254_v12 = vmax.f32 %v229_v9, %v248_v10 }
 0x121   :  { %v258_v14 = vmax.f32 %v165_v11, %v254_v12 }
 0x123   :  { %v260_v15 = vpack.c.bf16 %v258_v14, %v257_v13 }
 0x125   :  { %342 = vmatmul.bf16.vlgmr.msrb.gmra.mxu1 %v260_v15 }
 0x192   :  { %v338_v17 = vpop.f32.mrf.mxu0 }
 0x193   :  { %v339_v18 = vadd.f32 %v487_v16, %v338_v17 }
 0x195   :  { %348 = vst [vmem:[#allocation8] sm:$0xff] %v339_v18 }
 0x19a   :  { %v340_v19 = vpop.f32.mrf.mxu0 }
 0x19b   :  { %v341_v20 = vadd.f32 %v487_v16, %v340_v19 }
 0x19d   :  { %349 = vst [vmem:[#allocation8 + $0x8] sm:$0xff] %v341_v20 }
 0x1a2   :  { %v343_v21 = vpop.f32.mrf.mxu1 }
 0x1a3   :  { %v344_v22 = vadd.f32 %v487_v16, %v343_v21 }
 0x1a5   :  { %350 = vst [vmem:[#allocation8 + $0x10] sm:$0xff] %v344_v22 }
 0x1aa   :  { %v345_v23 = vpop.f32.mrf.mxu1 }
 0x1ab   :  { %v346_v24 = vadd.f32 %v487_v16, %v345_v23 }
 0x1ad   :  { %351 = vst [vmem:[#allocation8 + $0x18] sm:$0xff] %v346_v24 }
 0x1ae   :  { %364 = dma.vmem_to_hbm [thread:$0]  %s357_s9, 512, %s359_s12, [#allocation4], %s591_s23, %s591_s23, %s592_s24  }
 0x1af   :  { %588 = dma.done.wait [#allocation4], 512  }
 0x1b0   :  { %589 = vsyncadd [#allocation4], 4294966784 }
 0x1b1   :  { %369 = vsyncpa [#allocation3], 1 }
 0x1b2   :  { %370 = vsyncpa [#allocation6], 1 }
 0x1b3   :  { %371 = vsyncpa [#allocation4], 1 }

</bundles_post_ra>
